<compile_context>
chip_gen: v7x
topology: tpu7x:2x2x1
jax: 0.10.0
libtpu: 0.0.40
codegen_flags: <defaults>
</compile_context>

<pallas_src>
import jax
import jax.numpy as jnp
from jax.experimental import pallas as pl
from jax.experimental.pallas import tpu as pltpu


# ------------------------------ Pallas kernel -------------------------------
def _dwconv3x3_kernel(x_ref, w_ref, b_ref, o_ref):
    """Depthwise 3x3 (stride 1, pad 1), batch folded into the lane axis.

    x_ref : (H+2, W+2, BC)  zero-padded input image (same block every step)
    w_ref : (9, 1, BC)      per-tap weights, tap t = di*3 + dj
    b_ref : (1, 1, BC)      bias
    o_ref : (TH, W, BC)     this grid step's output rows
    """
    TH, Wo, _ = o_ref.shape
    row0 = pl.multiple_of(pl.program_id(0) * TH, TH)

    # Padded rows needed for this step's TH output rows (leading-dim slice:
    # no sublane/lane movement).
    xband = x_ref[pl.ds(row0, TH + 2), :, :]                 # (TH+2, W+2, BC)

    # Build the three column-shifted (sublane-axis) views once; the nine taps
    # below reuse them with leading-dim slices (whole-vreg selects).
    cols = [xband[:, dj:dj + Wo, :] for dj in range(3)]      # 3 x (TH+2, W, BC)

    w = w_ref[...]                                           # (9, 1, BC)
    # Start the accumulator from the bias (hoisted broadcast, saves one add).
    acc = jnp.broadcast_to(b_ref[...], o_ref.shape).astype(jnp.float32)
    for di in range(3):
        for dj in range(3):
            acc = acc + cols[dj][di:di + TH] * w[3 * di + dj]
    o_ref[...] = acc.astype(o_ref.dtype)


# --------------------------------- wrapper ----------------------------------
def dwconv_forward(x, weight, bias, H, W):
    """DWConv forward.

    x      : (B, N, C) float32 tokens, N = H*W
    weight : (C, 1, 3, 3) float32  (PyTorch depthwise Conv2d weight layout)
    bias   : (C,) float32
    returns (B, N, C) float32
    """
    B, Nt, C = x.shape
    assert Nt == H * W, (Nt, H, W)
    BC = B * C

    # Depthwise weights are identical across batch -> tile along the folded
    # batch*channel (lane) axis.  Per-tap layout (9, 1, C): tap t = di*3 + dj.
    w9 = weight[:, 0].transpose(1, 2, 0).reshape(9, 1, C)    # [t, 0, c]
    wt = jnp.tile(w9, (1, 1, B)).astype(jnp.float32)         # (9, 1, B*C)
    bt = jnp.tile(bias.reshape(1, 1, C), (1, 1, B)).astype(jnp.float32)

    # Fold batch into the lane axis: (B, N, C) -> (H, W, B*C); zero-pad
    # spatially for the padding=1 conv.  (Layout plumbing stays in XLA and
    # fuses under jit.)
    xi = x.astype(jnp.float32).transpose(1, 0, 2).reshape(H, W, BC)
    xpad = jnp.pad(xi, ((1, 1), (1, 1), (0, 0)))

    # Two parallel row-band steps so v7x's two TensorCores can split the work;
    # a single step when H is odd.
    n_steps = 2 if H % 2 == 0 else 1
    TH = H // n_steps

    out = pl.pallas_call(
        _dwconv3x3_kernel,
        out_shape=jax.ShapeDtypeStruct((H, W, BC), jnp.float32),
        grid=(n_steps,),
        in_specs=[
            pl.BlockSpec((H + 2, W + 2, BC), lambda i: (0, 0, 0)),  # full image
            pl.BlockSpec((9, 1, BC), lambda i: (0, 0, 0)),          # taps
            pl.BlockSpec((1, 1, BC), lambda i: (0, 0, 0)),          # bias
        ],
        out_specs=pl.BlockSpec((TH, W, BC), lambda i: (i, 0, 0)),
        compiler_params=pltpu.CompilerParams(
            dimension_semantics=("parallel",)),
    )(xpad, wt, bt)

    # Unfold batch from the lane axis: (H, W, B*C) -> (B, N, C).
    return out.reshape(Nt, B, C).transpose(1, 0, 2)


# --------------------------- pure-JAX reference ------------------------------
def dwconv_reference(x, weight, bias, H, W):
    B, Nt, C = x.shape
    img = x.transpose(0, 2, 1).reshape(B, C, H, W)           # NCHW like PyTorch
    out = jax.lax.conv_general_dilated(
        img, weight, window_strides=(1, 1), padding=((1, 1), (1, 1)),
        feature_group_count=C,
        dimension_numbers=("NCHW", "OIHW", "NCHW"),
        precision=jax.lax.Precision.HIGHEST)
    out = out + bias.reshape(1, C, 1, 1)
    return out.reshape(B, C, Nt).transpose(0, 2, 1)          # (B, N, C)


# ----------------------------------- main ------------------------------------
if __name__ == "__main__":
    # Shapes implied by the encoder that uses DWConv: B=2, hidden C=64,
    # H=W=8 -> N=64 tokens, and B*C = 128 (exactly one lane tile).
    B, C, H, W = 2, 64, 8, 8
    N = H * W

    kx, kw, kb = jax.random.split(jax.random.PRNGKey(0), 3)
    x = jax.random.normal(kx, (B, N, C), dtype=jnp.float32)
    weight = 0.1 * jax.random.normal(kw, (C, 1, 3, 3), dtype=jnp.float32)
    bias = 0.1 * jax.random.normal(kb, (C,), dtype=jnp.float32)

    fwd = jax.jit(lambda a: dwconv_forward(a, weight, bias, H, W))
    out = jax.block_until_ready(fwd(x))
    assert out.shape == (B, N, C), out.shape

    ref = dwconv_reference(x, weight, bias, H, W)
    max_err = float(jnp.max(jnp.abs(out - ref)))
    assert bool(jnp.allclose(out, ref, atol=1e-4, rtol=1e-4)), max_err

    print("KERNEL_OK")
</pallas_src>

<mosaic_0001>
module attributes {stable_mosaic.version = 11 : i64} {
  func.func @_dwconv3x3_kernel(%arg0: i32, %arg1: memref<10x10x128xf32, #tpu.memory_space<vmem>>, %arg2: memref<9x1x128xf32, #tpu.memory_space<vmem>>, %arg3: memref<1x1x128xf32, #tpu.memory_space<vmem>>, %arg4: memref<4x8x128xf32, #tpu.memory_space<vmem>>) attributes {dimension_semantics = [#tpu.dimension_semantics<parallel>], iteration_bounds = array<i64: 2>, scalar_prefetch = 0 : i64, scratch_operands = 0 : i64, tpu.core_type = #tpu.core_type<tc>, window_params = [{pipeline_mode = #tpu.pipeline_mode<synchronous>, transform_indices = @transform_0, window_bounds = array<i64: 10, 10, 128>}, {pipeline_mode = #tpu.pipeline_mode<synchronous>, transform_indices = @transform_1, window_bounds = array<i64: 9, 1, 128>}, {pipeline_mode = #tpu.pipeline_mode<synchronous>, transform_indices = @transform_2, window_bounds = array<i64: 1, 1, 128>}, {transform_indices = @transform_3, window_bounds = array<i64: 4, 8, 128>}]} {
    %c4_i32 = arith.constant 4 : i32
    %0 = arith.muli %arg0, %c4_i32 : i32
    %1 = tpu.assume_multiple %0, 4 : i32
    %2 = arith.index_cast %1 : i32 to index
    %c0 = arith.constant 0 : index
    %c0_0 = arith.constant 0 : index
    %3 = vector.load %arg1[%2, %c0, %c0_0] : memref<10x10x128xf32, #tpu.memory_space<vmem>>, vector<6x10x128xf32>
    %4 = vector.extract_strided_slice %3 {offsets = [0, 0, 0], sizes = [6, 8, 128], strides = [1, 1, 1]} : vector<6x10x128xf32> to vector<6x8x128xf32>
    %5 = vector.extract_strided_slice %3 {offsets = [0, 1, 0], sizes = [6, 8, 128], strides = [1, 1, 1]} : vector<6x10x128xf32> to vector<6x8x128xf32>
    %6 = vector.extract_strided_slice %3 {offsets = [0, 2, 0], sizes = [6, 8, 128], strides = [1, 1, 1]} : vector<6x10x128xf32> to vector<6x8x128xf32>
    %c0_1 = arith.constant 0 : index
    %c0_2 = arith.constant 0 : index
    %c0_3 = arith.constant 0 : index
    %7 = vector.load %arg2[%c0_1, %c0_2, %c0_3] : memref<9x1x128xf32, #tpu.memory_space<vmem>>, vector<9x1x128xf32>
    %c0_4 = arith.constant 0 : index
    %c0_5 = arith.constant 0 : index
    %c0_6 = arith.constant 0 : index
    %8 = vector.load %arg3[%c0_4, %c0_5, %c0_6] : memref<1x1x128xf32, #tpu.memory_space<vmem>>, vector<1x1x128xf32>
    %9 = vector.shape_cast %8 : vector<1x1x128xf32> to vector<1x1x128xf32>
    %10 = vector.broadcast %9 : vector<1x1x128xf32> to vector<4x8x128xf32>
    %11 = vector.extract_strided_slice %4 {offsets = [0, 0, 0], sizes = [4, 8, 128], strides = [1, 1, 1]} : vector<6x8x128xf32> to vector<4x8x128xf32>
    %12 = vector.extract_strided_slice %7 {offsets = [0, 0, 0], sizes = [1, 1, 128], strides = [1, 1, 1]} : vector<9x1x128xf32> to vector<1x1x128xf32>
    %13 = vector.shape_cast %12 : vector<1x1x128xf32> to vector<1x128xf32>
    %14 = vector.shape_cast %13 : vector<1x128xf32> to vector<1x1x128xf32>
    %15 = vector.broadcast %14 : vector<1x1x128xf32> to vector<4x8x128xf32>
    %16 = arith.mulf %11, %15 : vector<4x8x128xf32>
    %17 = arith.addf %10, %16 : vector<4x8x128xf32>
    %18 = vector.extract_strided_slice %5 {offsets = [0, 0, 0], sizes = [4, 8, 128], strides = [1, 1, 1]} : vector<6x8x128xf32> to vector<4x8x128xf32>
    %19 = vector.extract_strided_slice %7 {offsets = [1, 0, 0], sizes = [1, 1, 128], strides = [1, 1, 1]} : vector<9x1x128xf32> to vector<1x1x128xf32>
    %20 = vector.shape_cast %19 : vector<1x1x128xf32> to vector<1x128xf32>
    %21 = vector.shape_cast %20 : vector<1x128xf32> to vector<1x1x128xf32>
    %22 = vector.broadcast %21 : vector<1x1x128xf32> to vector<4x8x128xf32>
    %23 = arith.mulf %18, %22 : vector<4x8x128xf32>
    %24 = arith.addf %17, %23 : vector<4x8x128xf32>
    %25 = vector.extract_strided_slice %6 {offsets = [0, 0, 0], sizes = [4, 8, 128], strides = [1, 1, 1]} : vector<6x8x128xf32> to vector<4x8x128xf32>
    %26 = vector.extract_strided_slice %7 {offsets = [2, 0, 0], sizes = [1, 1, 128], strides = [1, 1, 1]} : vector<9x1x128xf32> to vector<1x1x128xf32>
    %27 = vector.shape_cast %26 : vector<1x1x128xf32> to vector<1x128xf32>
    %28 = vector.shape_cast %27 : vector<1x128xf32> to vector<1x1x128xf32>
    %29 = vector.broadcast %28 : vector<1x1x128xf32> to vector<4x8x128xf32>
    %30 = arith.mulf %25, %29 : vector<4x8x128xf32>
    %31 = arith.addf %24, %30 : vector<4x8x128xf32>
    %32 = vector.extract_strided_slice %4 {offsets = [1, 0, 0], sizes = [4, 8, 128], strides = [1, 1, 1]} : vector<6x8x128xf32> to vector<4x8x128xf32>
    %33 = vector.extract_strided_slice %7 {offsets = [3, 0, 0], sizes = [1, 1, 128], strides = [1, 1, 1]} : vector<9x1x128xf32> to vector<1x1x128xf32>
    %34 = vector.shape_cast %33 : vector<1x1x128xf32> to vector<1x128xf32>
    %35 = vector.shape_cast %34 : vector<1x128xf32> to vector<1x1x128xf32>
    %36 = vector.broadcast %35 : vector<1x1x128xf32> to vector<4x8x128xf32>
    %37 = arith.mulf %32, %36 : vector<4x8x128xf32>
    %38 = arith.addf %31, %37 : vector<4x8x128xf32>
    %39 = vector.extract_strided_slice %5 {offsets = [1, 0, 0], sizes = [4, 8, 128], strides = [1, 1, 1]} : vector<6x8x128xf32> to vector<4x8x128xf32>
    %40 = vector.extract_strided_slice %7 {offsets = [4, 0, 0], sizes = [1, 1, 128], strides = [1, 1, 1]} : vector<9x1x128xf32> to vector<1x1x128xf32>
    %41 = vector.shape_cast %40 : vector<1x1x128xf32> to vector<1x128xf32>
    %42 = vector.shape_cast %41 : vector<1x128xf32> to vector<1x1x128xf32>
    %43 = vector.broadcast %42 : vector<1x1x128xf32> to vector<4x8x128xf32>
    %44 = arith.mulf %39, %43 : vector<4x8x128xf32>
    %45 = arith.addf %38, %44 : vector<4x8x128xf32>
    %46 = vector.extract_strided_slice %6 {offsets = [1, 0, 0], sizes = [4, 8, 128], strides = [1, 1, 1]} : vector<6x8x128xf32> to vector<4x8x128xf32>
    %47 = vector.extract_strided_slice %7 {offsets = [5, 0, 0], sizes = [1, 1, 128], strides = [1, 1, 1]} : vector<9x1x128xf32> to vector<1x1x128xf32>
    %48 = vector.shape_cast %47 : vector<1x1x128xf32> to vector<1x128xf32>
    %49 = vector.shape_cast %48 : vector<1x128xf32> to vector<1x1x128xf32>
    %50 = vector.broadcast %49 : vector<1x1x128xf32> to vector<4x8x128xf32>
    %51 = arith.mulf %46, %50 : vector<4x8x128xf32>
    %52 = arith.addf %45, %51 : vector<4x8x128xf32>
    %53 = vector.extract_strided_slice %4 {offsets = [2, 0, 0], sizes = [4, 8, 128], strides = [1, 1, 1]} : vector<6x8x128xf32> to vector<4x8x128xf32>
    %54 = vector.extract_strided_slice %7 {offsets = [6, 0, 0], sizes = [1, 1, 128], strides = [1, 1, 1]} : vector<9x1x128xf32> to vector<1x1x128xf32>
    %55 = vector.shape_cast %54 : vector<1x1x128xf32> to vector<1x128xf32>
    %56 = vector.shape_cast %55 : vector<1x128xf32> to vector<1x1x128xf32>
    %57 = vector.broadcast %56 : vector<1x1x128xf32> to vector<4x8x128xf32>
    %58 = arith.mulf %53, %57 : vector<4x8x128xf32>
    %59 = arith.addf %52, %58 : vector<4x8x128xf32>
    %60 = vector.extract_strided_slice %5 {offsets = [2, 0, 0], sizes = [4, 8, 128], strides = [1, 1, 1]} : vector<6x8x128xf32> to vector<4x8x128xf32>
    %61 = vector.extract_strided_slice %7 {offsets = [7, 0, 0], sizes = [1, 1, 128], strides = [1, 1, 1]} : vector<9x1x128xf32> to vector<1x1x128xf32>
    %62 = vector.shape_cast %61 : vector<1x1x128xf32> to vector<1x128xf32>
    %63 = vector.shape_cast %62 : vector<1x128xf32> to vector<1x1x128xf32>
    %64 = vector.broadcast %63 : vector<1x1x128xf32> to vector<4x8x128xf32>
    %65 = arith.mulf %60, %64 : vector<4x8x128xf32>
    %66 = arith.addf %59, %65 : vector<4x8x128xf32>
    %67 = vector.extract_strided_slice %6 {offsets = [2, 0, 0], sizes = [4, 8, 128], strides = [1, 1, 1]} : vector<6x8x128xf32> to vector<4x8x128xf32>
    %68 = vector.extract_strided_slice %7 {offsets = [8, 0, 0], sizes = [1, 1, 128], strides = [1, 1, 1]} : vector<9x1x128xf32> to vector<1x1x128xf32>
    %69 = vector.shape_cast %68 : vector<1x1x128xf32> to vector<1x128xf32>
    %70 = vector.shape_cast %69 : vector<1x128xf32> to vector<1x1x128xf32>
    %71 = vector.broadcast %70 : vector<1x1x128xf32> to vector<4x8x128xf32>
    %72 = arith.mulf %67, %71 : vector<4x8x128xf32>
    %73 = arith.addf %66, %72 : vector<4x8x128xf32>
    %c0_7 = arith.constant 0 : index
    %c0_8 = arith.constant 0 : index
    %c0_9 = arith.constant 0 : index
    %74 = vector.load %arg4[%c0_7, %c0_8, %c0_9] : memref<4x8x128xf32, #tpu.memory_space<vmem>>, vector<4x8x128xf32>
    tpu.vector_store %arg4[%c0_7, %c0_8, %c0_9], %73 {strides = array<i32>} : memref<4x8x128xf32, #tpu.memory_space<vmem>>, vector<4x8x128xf32>,
    return
  }
  func.func @transform_0(%arg0: i32) -> (i32, i32, i32) {
    %c0_i32 = arith.constant 0 : i32
    %c0_i32_0 = arith.constant 0 : i32
    %c0_i32_1 = arith.constant 0 : i32
    %c0_i32_2 = arith.constant 0 : i32
    return %c0_i32, %c0_i32_0, %c0_i32_1 : i32, i32, i32
  }
  func.func @transform_1(%arg0: i32) -> (i32, i32, i32) {
    %c0_i32 = arith.constant 0 : i32
    %c0_i32_0 = arith.constant 0 : i32
    %c0_i32_1 = arith.constant 0 : i32
    %c0_i32_2 = arith.constant 0 : i32
    return %c0_i32, %c0_i32_0, %c0_i32_1 : i32, i32, i32
  }
  func.func @transform_2(%arg0: i32) -> (i32, i32, i32) {
    %c0_i32 = arith.constant 0 : i32
    %c0_i32_0 = arith.constant 0 : i32
    %c0_i32_1 = arith.constant 0 : i32
    %c0_i32_2 = arith.constant 0 : i32
    return %c0_i32, %c0_i32_0, %c0_i32_1 : i32, i32, i32
  }
  func.func @transform_3(%arg0: i32) -> (i32, i32, i32) {
    %c0_i32 = arith.constant 0 : i32
    %c0_i32_0 = arith.constant 0 : i32
    %c0_i32_1 = arith.constant 0 : i32
    return %arg0, %c0_i32, %c0_i32_0 : i32, i32, i32
  }
}

</mosaic_0001>

<bundles_post_ra>
// kernel: _lambda_.1
= control target key start
LH: loop header
LB: loop body
LE: loop exit
PB: predicated region body
PF: predicated region fallthrough
CT: control target
= control target key end

     0   :  { %s586_s12 = smov 0   ;;  %s815_s0 = inlined_call_operand.vmem [shape: f32[10,10,128], index: 0, kind: input, shape index: {}]   ;;  %s816_s1 = inlined_call_operand.vmem [shape: f32[9,1,128], index: 1, kind: input, shape index: {}]   ;;  %s817_s2 = inlined_call_operand.vmem [shape: f32[1,1,128], index: 2, kind: input, shape index: {}]   ;;  %s818_s3 = inlined_call_operand.vmem [shape: f32[8,8,128], index: 3, kind: output, shape index: {}]  }
   0x1 LB: > { %s529_s13 = sadd.s32 4294967295, %s564_s12   ;;  %p532_p0 = scmp.ge.s32.totalorder %s564_s12, 1  ;;  %s564_s12 = sphi %s586_s12, %s13_s12  }
   0x2   : > { %p127_p1 = scmp.lt.s32.totalorder %s564_s12, 3 }
   0x4   : > { %p128_p2 = pnand %p532_p0, %p127_p1 }
   0x5   : > { %s549_s14 = sshll.u32 (!%p128_p2), %s529_s13, 6  ;;  %v599_v0 = vld [vmem:[%s816_s1] ss:$0 sm:$0xff] (!%p128_p2)  ;;  %v604_v1 = vld [vmem:[%s816_s1 + $0x1] ss:$0 sm:$0xff] (!%p128_p2)  ;;  %vm219_vm0 = vcmask (!%p128_p2), 1046528  }
   0x6   : > { %131 = sbr.rel (%p128_p2) target bundleno = 60 (0x3c), region = 32  ;;  %s609_s21 = scalar_lea.vmem (!%p128_p2), %s815_s0, %s549_s14  ;;  %v614_v2 = vld [vmem:[%s816_s1 + $0x2] ss:$0 sm:$0xff] (!%p128_p2)  ;;  %v619_v3 = vld [vmem:[%s816_s1 + $0x3] ss:$0 sm:$0xff] (!%p128_p2)  ;;  %vm262_vm1 = vcmask (!%p128_p2), 1045504  }
   0x7   : > { %v155_v4 = vld [vmem:[%s609_s21] sm:$0xff] (!%p128_p2)  ;;  %v156_v5 = vld [vmem:[%s609_s21 + $0x8] sm:$0x3] (!%p128_p2)  ;;  %v157_v6 = vld [vmem:[%s609_s21 + $0x10] sm:$0xff] (!%p128_p2)  ;;  %s675_s11 = sshll.u32 (!%p128_p2), %s529_s13, 2 }
   0x8   : > { %v158_v7 = vld [vmem:[%s609_s21 + $0x18] sm:$0x3] (!%p128_p2)  ;;  %v189_v8 = vmul.f32 (!%p128_p2), %v599_v0, %v155_v4  ;;  %v203_v9 = vmul.f32 (!%p128_p2), %v604_v1, %v155_v4  ;;  %v204_v10 = vmul.f32 (!%p128_p2), %v604_v1, %v156_v5  ;;  %v246_v11 = vmul.f32 (!%p128_p2), %v614_v2, %v155_v4  ;;  %v632_v12 = vld [vmem:[%s816_s1 + $0x4] ss:$0 sm:$0xff] (!%p128_p2)  ;;  %v637_v13 = vld [vmem:[%s816_s1 + $0x5] ss:$0 sm:$0xff] (!%p128_p2) }
   0x9   : > { %v206_v14 = vmul.f32 (!%p128_p2), %v604_v1, %v158_v7  ;;  %v247_v15 = vmul.f32 (!%p128_p2), %v614_v2, %v156_v5  ;;  %v642_v16 = vmul.f32 (!%p128_p2), %v614_v2, %v158_v7  ;;  %v289_v17 = vmul.f32 (!%p128_p2), %v619_v3, %v157_v6  ;;  %v648_v18 = vld [vmem:[%s816_s1 + $0x6] ss:$0 sm:$0xff] (!%p128_p2)  ;;  %v653_v19 = vld [vmem:[%s816_s1 + $0x7] ss:$0 sm:$0xff] (!%p128_p2)  ;;  %v661_v24 = vld [vmem:[%s817_s2] ss:$0 sm:$0xff] (!%p128_p2) }
   0xa   : > { %v220_v20 = vrot.slane (!%p128_p2), %v203_v9, 1  ;;  %v303_v21 = vmul.f32 (!%p128_p2), %v632_v12, %v157_v6  ;;  %v304_v22 = vmul.f32 (!%p128_p2), %v632_v12, %v158_v7  ;;  %v345_v23 = vmul.f32 (!%p128_p2), %v637_v13, %v157_v6  ;;  %v664_v29 = vld [vmem:[%s609_s21 + $0x20] sm:$0xff] (!%p128_p2)  ;;  %v669_v30 = vld [vmem:[%s816_s1 + $0x8] ss:$0 sm:$0xff] (!%p128_p2)  ;;  %p147_p3 = scmp.lt.s32.totalorder (!%p128_p2), %s675_s11, 7 }
   0xb   : > { %v221_v25 = vrot.slane (!%p128_p2), %v204_v10, 1  ;;  %v224_v26 = vrot.slane (!%p128_p2), %v206_v14, 1  ;;  %v263_v27 = vrot.slane (!%p128_p2), %v246_v11, 2  ;;  %v264_v28 = vrot.slane (!%p128_p2), %v247_v15, 2  ;;  %v682_v39 = vld [vmem:[%s609_s21 + $0x28] sm:$0x3] (!%p128_p2) }
   0xc   : > { %v193_v31 = vadd.f32 (!%p128_p2), %v661_v24, %v189_v8  ;;  %v319_v32 = vrot.slane (!%p128_p2), %v303_v21, 1  ;;  %v320_v33 = vrot.slane (!%p128_p2), %v304_v22, 1  ;;  %v346_v34 = vmul.f32 (!%p128_p2), %v637_v13, %v158_v7  ;;  %v715_v8 = vld [vmem:[%s609_s21 + $0x30] sm:$0xff] (!%p128_p2)  ;;  %v725_v21 = vld [vmem:[%s609_s21 + $0x38] sm:$0x3] (!%p128_p2) }
   0xd   : > { %v222_v35 = vsel %vm219_vm0, %v220_v20, %v221_v25  ;;  %v265_v36 = vsel %vm262_vm1, %v263_v27, %v264_v28  ;;  %v361_v37 = vrot.slane %v345_v23, 2  ;;  %v387_v38 = vmul.f32 %v648_v18, %v664_v29  ;;  %s820_s11 = smov (!%p147_p3, %s675_s11), 7 }
   0xe   : > { %v236_v40 = vadd.f32 %v222_v35, %v193_v31  ;;  %v321_v41 = vsel %vm219_vm0, %v319_v32, %v320_v33  ;;  %v362_v42 = vrot.slane %v346_v34, 2  ;;  %v401_v43 = vmul.f32 %v653_v19, %v664_v29  ;;  %s534_s13 = sshll.u32 %s820_s11, 3 }
   0xf   : > { %v402_v44 = vmul.f32 %v653_v19, %v682_v39  ;;  %v443_v45 = vmul.f32 %v669_v30, %v664_v29  ;;  %v444_v46 = vmul.f32 %v669_v30, %v682_v39  ;;  %v190_v47 = vmul.f32 %v599_v0, %v157_v6  ;;  %s743_s16 = scalar_lea.vmem %s818_s3, %s534_s13 }
  0x10   : > { %v279_v48 = vadd.f32 %v265_v36, %v236_v40  ;;  %v363_v49 = vsel %vm262_vm1, %v361_v37, %v362_v42  ;;  %v417_v50 = vrot.slane %v401_v43, 1  ;;  %v205_v51 = vmul.f32 %v604_v1, %v157_v6 }
  0x11   : > { %v418_v52 = vrot.slane %v402_v44, 1  ;;  %v459_v53 = vrot.slane %v443_v45, 2  ;;  %v460_v54 = vrot.slane %v444_v46, 2  ;;  %v194_v55 = vadd.f32 %v661_v24, %v190_v47 }
  0x12   : > { %v293_v56 = vadd.f32 %v289_v17, %v279_v48  ;;  %v223_v57 = vrot.slane %v205_v51, 1  ;;  %v248_v58 = vmul.f32 %v614_v2, %v157_v6  ;;  %v267_v59 = vrot.slane %v642_v16, 2 }
  0x13   : > { %v419_v60 = vsel %vm219_vm0, %v417_v50, %v418_v52  ;;  %v461_v61 = vsel %vm262_vm1, %v459_v53, %v460_v54  ;;  %v290_v62 = vmul.f32 %v619_v3, %v664_v29  ;;  %v305_v63 = vmul.f32 %v632_v12, %v664_v29 }
  0x14   : > { %v335_v4 = vadd.f32 %v321_v41, %v293_v56  ;;  %v225_v5 = vsel %vm219_vm0, %v223_v57, %v224_v26  ;;  %v266_v6 = vrot.slane %v248_v58, 2  ;;  %v306_v7 = vmul.f32 %v632_v12, %v682_v39 }
  0x15   : > { %v237_v9 = vadd.f32 %v225_v5, %v194_v55  ;;  %v322_v10 = vrot.slane %v305_v63, 1  ;;  %v347_v11 = vmul.f32 %v637_v13, %v664_v29  ;;  %v348_v14 = vmul.f32 %v637_v13, %v682_v39  ;;  %v164_v5 = vld [vmem:[%s609_s21 + $0x48] sm:$0x3] }
  0x16   : > { %v377_v15 = vadd.f32 %v363_v49, %v335_v4  ;;  %v268_v16 = vsel %vm262_vm1, %v266_v6, %v267_v59  ;;  %v323_v17 = vrot.slane %v306_v7, 1  ;;  %v388_v20 = vmul.f32 %v648_v18, %v715_v8  ;;  %v163_v4 = vld [vmem:[%s609_s21 + $0x40] sm:$0xff] }
  0x17   : > { %v280_v22 = vadd.f32 %v268_v16, %v237_v9  ;;  %v364_v23 = vrot.slane %v347_v11, 2  ;;  %v365_v25 = vrot.slane %v348_v14, 2  ;;  %v403_v26 = vmul.f32 %v653_v19, %v715_v8 }
  0x18   : > { %v391_v27 = vadd.f32 %v387_v38, %v377_v15  ;;  %v324_v28 = vsel %vm219_vm0, %v322_v10, %v323_v17  ;;  %v404_v31 = vmul.f32 %v653_v19, %v725_v21  ;;  %v445_v32 = vmul.f32 %v669_v30, %v715_v8 }
  0x19   : > { %v294_v33 = vadd.f32 %v290_v62, %v280_v22  ;;  %v366_v34 = vsel %vm262_vm1, %v364_v23, %v365_v25  ;;  %v420_v35 = vrot.slane %v403_v26, 1  ;;  %v446_v36 = vmul.f32 %v669_v30, %v725_v21 }
  0x1a   : > { %v433_v37 = vadd.f32 %v419_v60, %v391_v27  ;;  %v421_v40 = vrot.slane %v404_v31, 1  ;;  %v462_v41 = vrot.slane %v445_v32, 2  ;;  %v191_v38 = vmul.f32 %v599_v0, %v664_v29 }
  0x1b   : > { %v336_v42 = vadd.f32 %v324_v28, %v294_v33  ;;  %v463_v43 = vrot.slane %v446_v36, 2  ;;  %v207_v44 = vmul.f32 %v604_v1, %v664_v29  ;;  %v208_v45 = vmul.f32 %v604_v1, %v682_v39 }
  0x1c   : > { %v475_v46 = vadd.f32 %v461_v61, %v433_v37  ;;  %v195_v47 = vadd.f32 %v661_v24, %v191_v38  ;;  %v250_v48 = vmul.f32 %v614_v2, %v664_v29  ;;  %v422_v50 = vsel %vm219_vm0, %v420_v35, %v421_v40 }
  0x1d   : > { %v378_v49 = vadd.f32 %v366_v34, %v336_v42  ;;  %v226_v51 = vrot.slane %v207_v44, 1  ;;  %v227_v52 = vrot.slane %v208_v45, 1  ;;  %v464_v53 = vsel %vm262_vm1, %v462_v41, %v463_v43 }
  0x1e   : > { %479 = vst [vmem:[%s743_s16] sm:$0xff] %v475_v46  ;;  %v251_v54 = vmul.f32 %v614_v2, %v682_v39  ;;  %v269_v55 = vrot.slane %v250_v48, 2  ;;  %v307_v56 = vmul.f32 %v632_v12, %v715_v8  ;;  %v308_v58 = vmul.f32 %v632_v12, %v725_v21 }
  0x1f   : > { %v392_v57 = vadd.f32 %v388_v20, %v378_v49  ;;  %v228_v29 = vsel %vm219_vm0, %v226_v51, %v227_v52  ;;  %v349_v59 = vmul.f32 %v637_v13, %v715_v8  ;;  %v350_v63 = vmul.f32 %v637_v13, %v725_v21  ;;  %v166_v49 = vld [vmem:[%s609_s21 + $0x58] sm:$0x3] }
  0x20   : > { %v238_v60 = vadd.f32 %v228_v29, %v195_v47  ;;  %v270_v61 = vrot.slane %v251_v54, 2  ;;  %v325_v62 = vrot.slane %v307_v56, 1  ;;  %v291_v6 = vmul.f32 %v619_v3, %v715_v8  ;;  %v165_v47 = vld [vmem:[%s609_s21 + $0x50] sm:$0xff] }
  0x21   : > { %v434_v39 = vadd.f32 %v422_v50, %v392_v57  ;;  %v326_v7 = vrot.slane %v308_v58, 1  ;;  %v367_v9 = vrot.slane %v349_v59, 2  ;;  %v368_v11 = vrot.slane %v350_v63, 2 }
  0x22   : > { %v271_v10 = vsel %vm262_vm1, %v269_v55, %v270_v61  ;;  %v405_v14 = vmul.f32 %v653_v19, %v163_v4  ;;  %v406_v15 = vmul.f32 %v653_v19, %v164_v5  ;;  %v389_v20 = vmul.f32 %v648_v18, %v163_v4 }
  0x23   : > { %v476_v16 = vadd.f32 %v464_v53, %v434_v39  ;;  %v281_v17 = vadd.f32 %v271_v10, %v238_v60  ;;  %v447_v22 = vmul.f32 %v669_v30, %v163_v4  ;;  %v327_v23 = vsel %vm219_vm0, %v325_v62, %v326_v7 }
  0x24   : > { %v423_v25 = vrot.slane %v405_v14, 1  ;;  %v424_v26 = vrot.slane %v406_v15, 1  ;;  %v448_v27 = vmul.f32 %v669_v30, %v164_v5  ;;  %v192_v32 = vmul.f32 %v599_v0, %v715_v8 }
  0x25   : > { %480 = vst [vmem:[%s743_s16 + $0x8] sm:$0xff] %v476_v16  ;;  %v295_v28 = vadd.f32 %v291_v6, %v281_v17  ;;  %v465_v31 = vrot.slane %v447_v22, 2  ;;  %v209_v33 = vmul.f32 %v604_v1, %v715_v8  ;;  %v369_v34 = vsel %vm262_vm1, %v367_v9, %v368_v11 }
  0x26   : > { %v466_v35 = vrot.slane %v448_v27, 2  ;;  %v210_v36 = vmul.f32 %v604_v1, %v725_v21  ;;  %v252_v37 = vmul.f32 %v614_v2, %v715_v8  ;;  %v196_v41 = vadd.f32 %v661_v24, %v192_v32 }
  0x27   : > { %v337_v40 = vadd.f32 %v327_v23, %v295_v28  ;;  %v229_v38 = vrot.slane %v209_v33, 1  ;;  %v253_v0 = vmul.f32 %v614_v2, %v725_v21  ;;  %v425_v42 = vsel %vm219_vm0, %v423_v25, %v424_v26 }
  0x28   : > { %v467_v43 = vsel %vm262_vm1, %v465_v31, %v466_v35  ;;  %v230_v44 = vrot.slane %v210_v36, 1  ;;  %v272_v45 = vrot.slane %v252_v37, 2  ;;  %v309_v1 = vmul.f32 %v632_v12, %v163_v4 }
  0x29   : > { %v379_v46 = vadd.f32 %v369_v34, %v337_v40  ;;  %v273_v48 = vrot.slane %v253_v0, 2  ;;  %v310_v8 = vmul.f32 %v632_v12, %v164_v5  ;;  %v292_v50 = vmul.f32 %v619_v3, %v163_v4 }
  0x2a   : > { %v231_v24 = vsel %vm219_vm0, %v229_v38, %v230_v44  ;;  %v351_v2 = vmul.f32 %v637_v13, %v163_v4  ;;  %v352_v21 = vmul.f32 %v637_v13, %v164_v5  ;;  %v328_v54 = vrot.slane %v309_v1, 1 }
  0x2b   : > { %v393_v51 = vadd.f32 %v389_v20, %v379_v46  ;;  %v239_v52 = vadd.f32 %v231_v24, %v196_v41  ;;  %v274_v53 = vsel %vm262_vm1, %v272_v45, %v273_v48  ;;  %v329_v55 = vrot.slane %v310_v8, 1 }
  0x2c   : > { %v370_v56 = vrot.slane %v351_v2, 2  ;;  %v371_v57 = vrot.slane %v352_v21, 2  ;;  %v407_v12 = vmul.f32 %v653_v19, %v165_v47  ;;  %v408_v59 = vmul.f32 %v653_v19, %v166_v49 }
  0x2d   : > { %v435_v29 = vadd.f32 %v425_v42, %v393_v51  ;;  %v282_v58 = vadd.f32 %v274_v53, %v239_v52  ;;  %v330_v3 = vsel %vm219_vm0, %v328_v54, %v329_v55  ;;  %v449_v60 = vmul.f32 %v669_v30, %v165_v47 }
  0x2e   : > { %v450_v13 = vmul.f32 %v669_v30, %v166_v49  ;;  %v372_v63 = vsel %vm262_vm1, %v370_v56, %v371_v57  ;;  %v426_v39 = vrot.slane %v407_v12, 1  ;;  %v427_v4 = vrot.slane %v408_v59, 1 }
  0x2f   : > { %v477_v61 = vadd.f32 %v467_v43, %v435_v29  ;;  %v296_v62 = vadd.f32 %v292_v50, %v282_v58  ;;  %v390_v6 = vmul.f32 %v648_v18, %v165_v47  ;;  %v468_v7 = vrot.slane %v449_v60, 2 }
  0x30   : > { %v469_v9 = vrot.slane %v450_v13, 2  ;;  %v428_v10 = vsel %vm219_vm0, %v426_v39, %v427_v4 }
  0x31   : > { %481 = vst [vmem:[%s743_s16 + $0x10] sm:$0xff] %v477_v61  ;;  %v338_v5 = vadd.f32 %v330_v3, %v296_v62 }
  0x32   : > { %v470_v14 = vsel %vm262_vm1, %v468_v7, %v469_v9 }
  0x33   : > { %v380_v19 = vadd.f32 %v372_v63, %v338_v5 }
  0x35   : > { %v394_v11 = vadd.f32 %v390_v6, %v380_v19 }
  0x37   : > { %v436_v30 = vadd.f32 %v428_v10, %v394_v11 }
  0x39   : > { %v478_v15 = vadd.f32 %v470_v14, %v436_v30 }
  0x3b   : > { %482 = vst [vmem:[%s743_s16 + $0x18] sm:$0xff] %v478_v15 }
  0x3c PF: > { %s13_s12 = sadd.s32 1, %s564_s12  }
  0x3d   : > { %p10_p4 = scmp.ge.s32.totalorder %s13_s12, 4  }
  0x3f   :  { %12 = sbr.rel (!%p10_p4) target bundleno = 1 (0x1), region = 60 }

</bundles_post_ra>
